<compile_context>
chip_gen: v7x
topology: tpu7x:2x2x1
jax: 0.10.0
libtpu: 0.0.40
codegen_flags: <defaults>
</compile_context>

<pallas_src>
import functools
import math

import jax
import jax.numpy as jnp
from jax.experimental import pallas as pl
from jax.experimental.pallas import tpu as pltpu


_INV_SQRT2 = 1.0 / math.sqrt(2.0)
_O_PAD = 128   # lane-dense padded width of the fused head output slab


# ----------------------------------------------------------------------------
# Fused Pallas kernel: single invocation, internal loop over the batch
# ----------------------------------------------------------------------------

def _fused_face_kernel(x_ref, wp_ref, bp_ref, q_ref, pos_ref,
                       whead_ref, bhead_ref, wo_ref, bo_ref,
                       o_ref, *, n_lin):
    # Hoist all weight loads out of the batch loop.
    wp = wp_ref[...]        # (D, C)   input_proj weight, pre-transposed
    bp = bp_ref[...]        # (D, 1)   input_proj bias
    q = q_ref[...]          # (P_pad, D)  query embedding, pre-scaled by 1/sqrt(D)
    pos = pos_ref[...]      # (D, HW)  positional encoding
    whead = whead_ref[...]  # (D, 128 + Hsum)  fused [linear heads | regressor fc_h]
    bhead = bhead_ref[...]  # (1, 128 + Hsum)
    wo = wo_ref[...]        # (Hsum, 128)  regressor fc_o (block-diagonal packed)
    bo = bo_ref[...]        # (1, 128)

    B = x_ref.shape[0]
    for b in range(B):      # tiny static batch -> unrolled
        # ---- input_proj: 1x1 conv == matmul over channels, (D, HW) layout ---
        x_b = x_ref[b]                                              # (C, HW)
        src = jnp.dot(wp, x_b, preferred_element_type=jnp.float32) + bp   # (D, HW)

        # ---- single cross-attention decoder step -----------------------------
        # keys = features + positional encoding, values = features (DETR style)
        k = src + pos                                               # (D, HW)
        # standard-form matmul: contraction dim of RHS on sublanes, no transpose
        s = jnp.dot(q, k, preferred_element_type=jnp.float32)       # (P_pad, HW)
        m = jnp.max(s, axis=-1, keepdims=True)
        p = jnp.exp(s - m)
        p = p * pl.reciprocal(jnp.sum(p, axis=-1, keepdims=True), approx=True)
        # p @ src^T, contracting the HW lane dims of both operands
        latent = jax.lax.dot_general(p, src, (((1,), (1,)), ((), ())),
                                     preferred_element_type=jnp.float32)  # (P_pad, D)

        # ---- heads: one fused latent matmul, split at the 128-lane boundary ---
        heads = (jnp.dot(latent, whead, preferred_element_type=jnp.float32)
                 + bhead)                                           # (P_pad, 128+Hsum)
        lin = heads[:, :n_lin]                                      # (P_pad, 128)
        h = heads[:, n_lin:]                                        # (P_pad, Hsum)
        # PropertyRegressor: fc_o(gelu(fc_h(x))), exact (erf) GELU like F.gelu
        h = 0.5 * h * (1.0 + jax.lax.erf(h * _INV_SQRT2))
        reg = jnp.dot(h, wo, preferred_element_type=jnp.float32) + bo     # (P_pad, 128)
        # lane ranges of `lin` and `reg` are disjoint by construction -> sum merges
        o_ref[b] = (lin + reg).astype(o_ref.dtype)


def fused_face_forward(x_bchw_flat, arrays):
    """x_bchw_flat: [B, C, HW] (free reshape of NCHW) -> [B, P_pad, 128] slab."""
    B = x_bchw_flat.shape[0]
    P_pad = arrays["q"].shape[0]
    O = arrays["wo"].shape[1]

    vmem = pltpu.MemorySpace.VMEM
    return pl.pallas_call(
        functools.partial(_fused_face_kernel, n_lin=O),
        out_shape=jax.ShapeDtypeStruct((B, P_pad, O), jnp.float32),
        in_specs=[pl.BlockSpec(memory_space=vmem)] * 9,
        out_specs=pl.BlockSpec(memory_space=vmem),
    )(x_bchw_flat, arrays["wp"], arrays["bp"], arrays["q"], arrays["pos"],
      arrays["whead"], arrays["bhead"], arrays["wo"], arrays["bo"])


# ----------------------------------------------------------------------------
# Parameter setup (deterministic, synthetic) and head packing
# ----------------------------------------------------------------------------

def _xavier_uniform(key, fan_in, fan_out):
    limit = math.sqrt(6.0 / (fan_in + fan_out))
    # stored as [in, out]; pack_params transposes where the kernel needs it
    return jax.random.uniform(key, (fan_in, fan_out), jnp.float32, -limit, limit)


def _sine_pos_embed(hw, d):
    pos = jnp.arange(hw, dtype=jnp.float32)[:, None]               # [HW, 1]
    dim = jnp.arange(d, dtype=jnp.float32)[None, :]                # [1, D]
    div = jnp.exp(-(2.0 * jnp.floor(dim / 2.0) / d) * math.log(10000.0))
    ang = pos * div
    pe = jnp.where((jnp.arange(d) % 2) == 0, jnp.sin(ang), jnp.cos(ang))
    return pe                                                      # [HW, D]


def init_params(key, num_channels, decoder_dim, properties, hw):
    keys = jax.random.split(key, 16)
    params = {
        # Conv2d(num_channels, D, kernel_size=1): weight [D, C, 1, 1] -> stored [C, D]
        "input_proj_w": _xavier_uniform(keys[0], num_channels, decoder_dim),
        "input_proj_b": jnp.zeros((1, decoder_dim), jnp.float32),
        # nn.Embedding(num_properties, D)
        "query_embed": jax.random.normal(
            keys[1], (len(properties), decoder_dim), jnp.float32),
        # positional encoding (stand-in for the backbone's pos embedding)
        "pos_embed": _sine_pos_embed(hw, decoder_dim),
        # binary_cls_head: Linear(D, 1), shared across all binary_cls properties
        "binary_w": _xavier_uniform(keys[2], decoder_dim, 1),
        "binary_b": jnp.zeros((1, 1), jnp.float32),
        "multi_cls_heads": [],
        "reg_heads": [],
    }
    k_idx = 3
    for prop, pdict in properties.items():
        ptype, pdim = pdict["type"], pdict["dim"]
        if ptype == "multi_cls":
            w = _xavier_uniform(keys[k_idx], decoder_dim, pdim); k_idx += 1
            params["multi_cls_heads"].append((w, jnp.zeros((1, pdim), jnp.float32)))
        elif ptype == "sigmoid_regression":
            wh = _xavier_uniform(keys[k_idx], decoder_dim, 2 * decoder_dim); k_idx += 1
            wo = _xavier_uniform(keys[k_idx], 2 * decoder_dim, pdim); k_idx += 1
            params["reg_heads"].append(
                (wh, jnp.zeros((1, 2 * decoder_dim), jnp.float32),
                 wo, jnp.zeros((1, pdim), jnp.float32)))
    return params


def pack_params(params, properties, decoder_dim):
    """Pack heads into lane-dense fused matrices / kernel-friendly layouts."""
    D = decoder_dim
    P = len(properties)
    P_pad = ((P + 7) // 8) * 8                                     # sublane multiple

    # padded query embedding (extra rows are zero; their outputs are never read)
    # 1/sqrt(D) attention scale folded in at pack time (one-off, host side).
    q_pad = jnp.zeros((P_pad, D), jnp.float32).at[:P].set(params["query_embed"])
    q_pad = q_pad * (1.0 / math.sqrt(D))

    w_lin = jnp.zeros((D, _O_PAD), jnp.float32)
    b_lin = jnp.zeros((1, _O_PAD), jnp.float32)
    wh_list, bh_list, reg_entries = [], [], []
    slices = {}
    lane = 0
    cls_j = reg_j = 0
    for i, (prop, pdict) in enumerate(properties.items()):
        pdim, ptype = pdict["dim"], pdict["type"]
        slices[prop] = (i, lane, pdim)
        if ptype == "binary_cls":
            w, b = params["binary_w"], params["binary_b"]
            w_lin = w_lin.at[:, lane:lane + pdim].set(w)
            b_lin = b_lin.at[:, lane:lane + pdim].set(b)
        elif ptype == "multi_cls":
            w, b = params["multi_cls_heads"][cls_j]; cls_j += 1
            w_lin = w_lin.at[:, lane:lane + pdim].set(w)
            b_lin = b_lin.at[:, lane:lane + pdim].set(b)
        elif ptype == "sigmoid_regression":
            wh, bh, wo, bo = params["reg_heads"][reg_j]; reg_j += 1
            wh_list.append(wh); bh_list.append(bh)
            reg_entries.append((lane, pdim, wo, bo))
        else:
            raise NotImplementedError(ptype)
        lane += pdim
    # TODO(synk): if total head output exceeds 128 lanes, pad O to the next 128 multiple.
    assert lane <= _O_PAD, "fused head output exceeds one 128-lane slab"

    if wh_list:
        wh_all = jnp.concatenate(wh_list, axis=1)                  # [D, 2D*n_reg]
        bh_all = jnp.concatenate(bh_list, axis=1)                  # [1, 2D*n_reg]
        hsum = wh_all.shape[1]
        wo_all = jnp.zeros((hsum, _O_PAD), jnp.float32)
        bo_all = jnp.zeros((1, _O_PAD), jnp.float32)
        off = 0
        for lane0, pdim, wo, bo in reg_entries:
            h = wo.shape[0]
            wo_all = wo_all.at[off:off + h, lane0:lane0 + pdim].set(wo)
            bo_all = bo_all.at[:, lane0:lane0 + pdim].set(bo)
            off += h
    else:                                                          # no regressor heads
        hsum = 8
        wh_all = jnp.zeros((D, hsum), jnp.float32)
        bh_all = jnp.zeros((1, hsum), jnp.float32)
        wo_all = jnp.zeros((hsum, _O_PAD), jnp.float32)
        bo_all = jnp.zeros((1, _O_PAD), jnp.float32)

    # fuse linear-heads weight with regressor fc_h weight -> one latent matmul
    whead = jnp.concatenate([w_lin, wh_all], axis=1)               # [D, 128+Hsum]
    bhead = jnp.concatenate([b_lin, bh_all], axis=1)               # [1, 128+Hsum]

    return {
        # (D, HW) / (D, C) lane-dense layouts, pre-transposed at pack time
        "wp": params["input_proj_w"].T,       # (D, C)
        "bp": params["input_proj_b"].T,       # (D, 1)
        "pos": params["pos_embed"].T,         # (D, HW)
        "q": q_pad,                           # (P_pad, D), pre-scaled
        "whead": whead, "bhead": bhead,
        "wo": wo_all, "bo": bo_all,
        "slices": slices,
    }


# ----------------------------------------------------------------------------
# FaceTransformer forward (jitted wrapper / glue)
# ----------------------------------------------------------------------------

def make_forward(packed):
    slices = packed["slices"]
    arrays = {k: v for k, v in packed.items() if k != "slices"}

    @jax.jit
    def _fwd(x_nchw, arrays):
        """x_nchw: backbone feature map [B, C, H, W] (NCHW, like PyTorch)."""
        B, C, H, W = x_nchw.shape
        # free reshape only: channels on sublanes, HW on lanes (no transpose)
        x = x_nchw.reshape(B, C, H * W)
        out_slab = fused_face_forward(x, arrays)                   # [B, P_pad, 128]
        return {prop: out_slab[:, row, lane0:lane0 + pdim]         # [B, pdim]
                for prop, (row, lane0, pdim) in slices.items()}

    return lambda x_nchw: _fwd(x_nchw, arrays)


# ----------------------------------------------------------------------------
# Main
# ----------------------------------------------------------------------------

if __name__ == "__main__":
    key = jax.random.PRNGKey(0)

    B, C, H, W = 2, 4, 16, 16        # backbone feature map (small synthetic shapes)
    decoder_dim = 32

    properties = {
        "gender":     {"dim": 1, "type": "binary_cls"},
        "expression": {"dim": 7, "type": "multi_cls"},
        "pose":       {"dim": 3, "type": "sigmoid_regression"},
    }

    params = init_params(key, C, decoder_dim, properties, H * W)
    packed = pack_params(params, properties, decoder_dim)
    forward = make_forward(packed)

    x = jax.random.normal(jax.random.fold_in(key, 99), (B, C, H, W), jnp.float32)

    out = forward(x)
    jax.block_until_ready(out)

    # sanity on output shapes: binary (B,1), multi_cls (B,7), regression (B,3)
    assert out["gender"].shape == (B, 1)
    assert out["expression"].shape == (B, 7)
    assert out["pose"].shape == (B, 3)
    assert all(jnp.all(jnp.isfinite(v)) for v in out.values())

    print("KERNEL_OK")
</pallas_src>

<mosaic_0001>
module attributes {stable_mosaic.version = 11 : i64} {
  func.func @_fused_face_kernel(%arg0: memref<2x4x256xf32, #tpu.memory_space<vmem>>, %arg1: memref<32x4xf32, #tpu.memory_space<vmem>>, %arg2: memref<32x1xf32, #tpu.memory_space<vmem>>, %arg3: memref<8x32xf32, #tpu.memory_space<vmem>>, %arg4: memref<32x256xf32, #tpu.memory_space<vmem>>, %arg5: memref<32x192xf32, #tpu.memory_space<vmem>>, %arg6: memref<1x192xf32, #tpu.memory_space<vmem>>, %arg7: memref<64x128xf32, #tpu.memory_space<vmem>>, %arg8: memref<1x128xf32, #tpu.memory_space<vmem>>, %arg9: memref<2x8x128xf32, #tpu.memory_space<vmem>>) attributes {dimension_semantics = [], scalar_prefetch = 0 : i64, scratch_operands = 0 : i64, tpu.core_type = #tpu.core_type<tc>} {
    %c0 = arith.constant 0 : index
    %c0_0 = arith.constant 0 : index
    %0 = vector.load %arg1[%c0, %c0_0] : memref<32x4xf32, #tpu.memory_space<vmem>>, vector<32x4xf32>
    %c0_1 = arith.constant 0 : index
    %c0_2 = arith.constant 0 : index
    %1 = vector.load %arg2[%c0_1, %c0_2] : memref<32x1xf32, #tpu.memory_space<vmem>>, vector<32x1xf32>
    %c0_3 = arith.constant 0 : index
    %c0_4 = arith.constant 0 : index
    %2 = vector.load %arg3[%c0_3, %c0_4] : memref<8x32xf32, #tpu.memory_space<vmem>>, vector<8x32xf32>
    %c0_5 = arith.constant 0 : index
    %c0_6 = arith.constant 0 : index
    %3 = vector.load %arg4[%c0_5, %c0_6] : memref<32x256xf32, #tpu.memory_space<vmem>>, vector<32x256xf32>
    %c0_7 = arith.constant 0 : index
    %c0_8 = arith.constant 0 : index
    %4 = vector.load %arg5[%c0_7, %c0_8] : memref<32x192xf32, #tpu.memory_space<vmem>>, vector<32x192xf32>
    %c0_9 = arith.constant 0 : index
    %c0_10 = arith.constant 0 : index
    %5 = vector.load %arg6[%c0_9, %c0_10] : memref<1x192xf32, #tpu.memory_space<vmem>>, vector<1x192xf32>
    %c0_11 = arith.constant 0 : index
    %c0_12 = arith.constant 0 : index
    %6 = vector.load %arg7[%c0_11, %c0_12] : memref<64x128xf32, #tpu.memory_space<vmem>>, vector<64x128xf32>
    %c0_13 = arith.constant 0 : index
    %c0_14 = arith.constant 0 : index
    %7 = vector.load %arg8[%c0_13, %c0_14] : memref<1x128xf32, #tpu.memory_space<vmem>>, vector<1x128xf32>
    %c0_15 = arith.constant 0 : index
    %c0_16 = arith.constant 0 : index
    %c0_17 = arith.constant 0 : index
    %8 = vector.load %arg0[%c0_15, %c0_16, %c0_17] : memref<2x4x256xf32, #tpu.memory_space<vmem>>, vector<1x4x256xf32>
    %9 = vector.shape_cast %8 : vector<1x4x256xf32> to vector<4x256xf32>
    %cst = arith.constant dense<0.000000e+00> : vector<32x256xf32>
    %10 = tpu.matmul %0, %9, %cst {dimension_numbers = #tpu.dot_dimension_numbers<[1], [0], [0], [1], [0, 0, 1, 1], [], []>} : vector<32x4xf32>, vector<4x256xf32>, vector<32x256xf32> -> vector<32x256xf32>
    %11 = vector.broadcast %1 : vector<32x1xf32> to vector<32x256xf32>
    %12 = arith.addf %10, %11 : vector<32x256xf32>
    %13 = arith.addf %12, %3 : vector<32x256xf32>
    %cst_18 = arith.constant dense<0.000000e+00> : vector<8x256xf32>
    %14 = tpu.matmul %2, %13, %cst_18 {dimension_numbers = #tpu.dot_dimension_numbers<[1], [0], [0], [1], [0, 0, 1, 1], [], []>} : vector<8x32xf32>, vector<32x256xf32>, vector<8x256xf32> -> vector<8x256xf32>
    %cst_19 = arith.constant dense<0xFF800000> : vector<8xf32>
    %15 = vector.multi_reduction <maximumf>, %14, %cst_19 [1] : vector<8x256xf32> to vector<8xf32>
    %16 = vector.shape_cast %15 : vector<8xf32> to vector<8x1xf32>
    %17 = vector.broadcast %16 : vector<8x1xf32> to vector<8x256xf32>
    %18 = arith.subf %14, %17 : vector<8x256xf32>
    %19 = math.exp %18 : vector<8x256xf32>
    %cst_20 = arith.constant dense<0.000000e+00> : vector<8xf32>
    %20 = vector.multi_reduction <add>, %19, %cst_20 [1] : vector<8x256xf32> to vector<8xf32>
    %21 = vector.shape_cast %20 : vector<8xf32> to vector<8x1xf32>
    %22 = tpu.reciprocal %21 {approx = true} : vector<8x1xf32> -> vector<8x1xf32>
    %23 = vector.broadcast %22 : vector<8x1xf32> to vector<8x256xf32>
    %24 = arith.mulf %19, %23 : vector<8x256xf32>
    %cst_21 = arith.constant dense<0.000000e+00> : vector<8x32xf32>
    %25 = tpu.matmul %24, %12, %cst_21 {dimension_numbers = #tpu.dot_dimension_numbers<[1], [1], [0], [0], [0, 0, 1, 0], [], []>} : vector<8x256xf32>, vector<32x256xf32>, vector<8x32xf32> -> vector<8x32xf32>
    %cst_22 = arith.constant dense<0.000000e+00> : vector<8x192xf32>
    %26 = tpu.matmul %25, %4, %cst_22 {dimension_numbers = #tpu.dot_dimension_numbers<[1], [0], [0], [1], [0, 0, 1, 1], [], []>} : vector<8x32xf32>, vector<32x192xf32>, vector<8x192xf32> -> vector<8x192xf32>
    %27 = vector.broadcast %5 : vector<1x192xf32> to vector<8x192xf32>
    %28 = arith.addf %26, %27 : vector<8x192xf32>
    %29 = vector.extract_strided_slice %28 {offsets = [0, 0], sizes = [8, 128], strides = [1, 1]} : vector<8x192xf32> to vector<8x128xf32>
    %30 = vector.extract_strided_slice %28 {offsets = [0, 128], sizes = [8, 64], strides = [1, 1]} : vector<8x192xf32> to vector<8x64xf32>
    %cst_23 = arith.constant 5.000000e-01 : f32
    %31 = vector.broadcast %cst_23 : f32 to vector<8x64xf32>
    %32 = arith.mulf %31, %30 : vector<8x64xf32>
    %cst_24 = arith.constant 0.707106769 : f32
    %33 = vector.broadcast %cst_24 : f32 to vector<8x64xf32>
    %34 = arith.mulf %30, %33 : vector<8x64xf32>
    %35 = math.erf %34 : vector<8x64xf32>
    %cst_25 = arith.constant 1.000000e+00 : f32
    %36 = vector.broadcast %cst_25 : f32 to vector<8x64xf32>
    %37 = arith.addf %36, %35 : vector<8x64xf32>
    %38 = arith.mulf %32, %37 : vector<8x64xf32>
    %cst_26 = arith.constant dense<0.000000e+00> : vector<8x128xf32>
    %39 = tpu.matmul %38, %6, %cst_26 {dimension_numbers = #tpu.dot_dimension_numbers<[1], [0], [0], [1], [0, 0, 1, 1], [], []>} : vector<8x64xf32>, vector<64x128xf32>, vector<8x128xf32> -> vector<8x128xf32>
    %40 = vector.broadcast %7 : vector<1x128xf32> to vector<8x128xf32>
    %41 = arith.addf %39, %40 : vector<8x128xf32>
    %42 = arith.addf %29, %41 : vector<8x128xf32>
    %c0_27 = arith.constant 0 : index
    %c0_28 = arith.constant 0 : index
    %c0_29 = arith.constant 0 : index
    %43 = vector.load %arg9[%c0_27, %c0_28, %c0_29] : memref<2x8x128xf32, #tpu.memory_space<vmem>>, vector<1x8x128xf32>
    %44 = vector.shape_cast %43 : vector<1x8x128xf32> to vector<8x128xf32>
    %45 = vector.shape_cast %42 : vector<8x128xf32> to vector<1x8x128xf32>
    tpu.vector_store %arg9[%c0_27, %c0_28, %c0_29], %45 {strides = array<i32>} : memref<2x8x128xf32, #tpu.memory_space<vmem>>, vector<1x8x128xf32>,
    %c1 = arith.constant 1 : index
    %c0_30 = arith.constant 0 : index
    %c0_31 = arith.constant 0 : index
    %46 = vector.load %arg0[%c1, %c0_30, %c0_31] : memref<2x4x256xf32, #tpu.memory_space<vmem>>, vector<1x4x256xf32>
    %47 = vector.shape_cast %46 : vector<1x4x256xf32> to vector<4x256xf32>
    %cst_32 = arith.constant dense<0.000000e+00> : vector<32x256xf32>
    %48 = tpu.matmul %0, %47, %cst_32 {dimension_numbers = #tpu.dot_dimension_numbers<[1], [0], [0], [1], [0, 0, 1, 1], [], []>} : vector<32x4xf32>, vector<4x256xf32>, vector<32x256xf32> -> vector<32x256xf32>
    %49 = vector.broadcast %1 : vector<32x1xf32> to vector<32x256xf32>
    %50 = arith.addf %48, %49 : vector<32x256xf32>
    %51 = arith.addf %50, %3 : vector<32x256xf32>
    %cst_33 = arith.constant dense<0.000000e+00> : vector<8x256xf32>
    %52 = tpu.matmul %2, %51, %cst_33 {dimension_numbers = #tpu.dot_dimension_numbers<[1], [0], [0], [1], [0, 0, 1, 1], [], []>} : vector<8x32xf32>, vector<32x256xf32>, vector<8x256xf32> -> vector<8x256xf32>
    %cst_34 = arith.constant dense<0xFF800000> : vector<8xf32>
    %53 = vector.multi_reduction <maximumf>, %52, %cst_34 [1] : vector<8x256xf32> to vector<8xf32>
    %54 = vector.shape_cast %53 : vector<8xf32> to vector<8x1xf32>
    %55 = vector.broadcast %54 : vector<8x1xf32> to vector<8x256xf32>
    %56 = arith.subf %52, %55 : vector<8x256xf32>
    %57 = math.exp %56 : vector<8x256xf32>
    %cst_35 = arith.constant dense<0.000000e+00> : vector<8xf32>
    %58 = vector.multi_reduction <add>, %57, %cst_35 [1] : vector<8x256xf32> to vector<8xf32>
    %59 = vector.shape_cast %58 : vector<8xf32> to vector<8x1xf32>
    %60 = tpu.reciprocal %59 {approx = true} : vector<8x1xf32> -> vector<8x1xf32>
    %61 = vector.broadcast %60 : vector<8x1xf32> to vector<8x256xf32>
    %62 = arith.mulf %57, %61 : vector<8x256xf32>
    %cst_36 = arith.constant dense<0.000000e+00> : vector<8x32xf32>
    %63 = tpu.matmul %62, %50, %cst_36 {dimension_numbers = #tpu.dot_dimension_numbers<[1], [1], [0], [0], [0, 0, 1, 0], [], []>} : vector<8x256xf32>, vector<32x256xf32>, vector<8x32xf32> -> vector<8x32xf32>
    %cst_37 = arith.constant dense<0.000000e+00> : vector<8x192xf32>
    %64 = tpu.matmul %63, %4, %cst_37 {dimension_numbers = #tpu.dot_dimension_numbers<[1], [0], [0], [1], [0, 0, 1, 1], [], []>} : vector<8x32xf32>, vector<32x192xf32>, vector<8x192xf32> -> vector<8x192xf32>
    %65 = vector.broadcast %5 : vector<1x192xf32> to vector<8x192xf32>
    %66 = arith.addf %64, %65 : vector<8x192xf32>
    %67 = vector.extract_strided_slice %66 {offsets = [0, 0], sizes = [8, 128], strides = [1, 1]} : vector<8x192xf32> to vector<8x128xf32>
    %68 = vector.extract_strided_slice %66 {offsets = [0, 128], sizes = [8, 64], strides = [1, 1]} : vector<8x192xf32> to vector<8x64xf32>
    %cst_38 = arith.constant 5.000000e-01 : f32
    %69 = vector.broadcast %cst_38 : f32 to vector<8x64xf32>
    %70 = arith.mulf %69, %68 : vector<8x64xf32>
    %cst_39 = arith.constant 0.707106769 : f32
    %71 = vector.broadcast %cst_39 : f32 to vector<8x64xf32>
    %72 = arith.mulf %68, %71 : vector<8x64xf32>
    %73 = math.erf %72 : vector<8x64xf32>
    %cst_40 = arith.constant 1.000000e+00 : f32
    %74 = vector.broadcast %cst_40 : f32 to vector<8x64xf32>
    %75 = arith.addf %74, %73 : vector<8x64xf32>
    %76 = arith.mulf %70, %75 : vector<8x64xf32>
    %cst_41 = arith.constant dense<0.000000e+00> : vector<8x128xf32>
    %77 = tpu.matmul %76, %6, %cst_41 {dimension_numbers = #tpu.dot_dimension_numbers<[1], [0], [0], [1], [0, 0, 1, 1], [], []>} : vector<8x64xf32>, vector<64x128xf32>, vector<8x128xf32> -> vector<8x128xf32>
    %78 = vector.broadcast %7 : vector<1x128xf32> to vector<8x128xf32>
    %79 = arith.addf %77, %78 : vector<8x128xf32>
    %80 = arith.addf %67, %79 : vector<8x128xf32>
    %c1_42 = arith.constant 1 : index
    %c0_43 = arith.constant 0 : index
    %c0_44 = arith.constant 0 : index
    %81 = vector.load %arg9[%c1_42, %c0_43, %c0_44] : memref<2x8x128xf32, #tpu.memory_space<vmem>>, vector<1x8x128xf32>
    %82 = vector.shape_cast %81 : vector<1x8x128xf32> to vector<8x128xf32>
    %83 = vector.shape_cast %80 : vector<8x128xf32> to vector<1x8x128xf32>
    tpu.vector_store %arg9[%c1_42, %c0_43, %c0_44], %83 {strides = array<i32>} : memref<2x8x128xf32, #tpu.memory_space<vmem>>, vector<1x8x128xf32>,
    return
  }
}

</mosaic_0001>

<bundles_post_ra>
// kernel: _fwd.1
= control target key start
LH: loop header
LB: loop body
LE: loop exit
PB: predicated region body
PF: predicated region fallthrough
CT: control target
= control target key end

     0   :  { %vm103_vm0 = vcmask 1043456   ;;  %v1130_v1 = vmov 0.0   ;;  %v1131_v2 = vmov 0   ;;  %vm90_vm1 = vcmask 31744   ;;  %s1463_s0 = inlined_call_operand.vmem [shape: f32[2,4,256], index: 0, kind: input, shape index: {}]   ;;  %s1464_s1 = inlined_call_operand.vmem [shape: f32[32,4], index: 1, kind: input, shape index: {}]   ;;  %s1465_s2 = inlined_call_operand.vmem [shape: f32[32,1], index: 2, kind: input, shape index: {}]   ;;  %s1466_s4 = inlined_call_operand.vmem [shape: f32[32,256], index: 4, kind: input, shape index: {}]   ;;  %s1467_s3 = inlined_call_operand.vmem [shape: f32[8,32], index: 3, kind: input, shape index: {}]   ;;  %s1468_s5 = inlined_call_operand.vmem [shape: f32[32,192], index: 5, kind: input, shape index: {}]   ;;  %s1469_s7 = inlined_call_operand.vmem [shape: f32[64,128], index: 7, kind: input, shape index: {}]   ;;  %s1470_s6 = inlined_call_operand.vmem [shape: f32[1,192], index: 6, kind: input, shape index: {}]   ;;  %s1471_s8 = inlined_call_operand.vmem [shape: f32[1,128], index: 8, kind: input, shape index: {}]   ;;  %s1472_s9 = inlined_call_operand.vmem [shape: f32[2,8,128], index: 9, kind: output, shape index: {}]  }
   0x1   :  { %v67_v0 = vld [vmem:[%s1463_s0] sm:$0xff]  ;;  %172 = vmatprep.mubr.f32.mxu0 %v1130_v1  ;;  %1110 = vset.pattern.permute.xlu0 %v1131_v2  ;;  %v38_v6 = vld [vmem:[%s1465_s2 + $0x10] sm:$0xff]  ;;  %v37_v7 = vld [vmem:[%s1465_s2 + $0x8] sm:$0xff]  ;;  %vm205_vm2 = vcmask 261120   ;;  %vm1133_vm3 = vmmov 0   ;;  %vm461_vm4 = vcmask 523264  }
   0x2   :  { %v89_v3 = vcombine.high %v67_v0, %v67_v0  ;;  %1111 = vset.pattern.permute.xlu1 %v1131_v2  ;;  %273 = vmatprep.mubr.f32.mxu1 %v1130_v1  ;;  %v1192_v4 = vld [vmem:[%s1464_s1] sm:$0xff]  ;;  %v39_v8 = vld [vmem:[%s1465_s2 + $0x18] sm:$0xff]  ;;  %v1214_v9 = vld [vmem:[%s1464_s1 + $0x8] sm:$0xff] }
   0x3   :  { %v36_v5 = vld [vmem:[%s1465_s2] sm:$0xff]  ;;  %80 = vperm.xlu1 %1111, %v38_v6   ;;  %v1222_v10 = vld [vmem:[%s1464_s1 + $0x10] sm:$0xff]  ;;  %v1230_v11 = vld [vmem:[%s1464_s1 + $0x18] sm:$0xff] }
   0x4   :  { %957 = vmatprep.subr.msk.mxu0 %vm103_vm0, %v89_v3  ;;  %70 = vperm.xlu0 %1110, %v36_v5   ;;  %v1242_v17 = vld [vmem:[%s1466_s4] sm:$0xff]  ;;  %v1248_v19 = vld [vmem:[%s1466_s4 + $0x10] sm:$0xff]  ;;  %v1254_v23 = vld [vmem:[%s1466_s4 + $0x8] sm:$0xff] }
   0x5   :  { %958 = vmatpush1.msk.msra.mxu0 %vm103_vm0, %v67_v0  ;;  %v1259_v24 = vld [vmem:[%s1466_s4 + $0x18] sm:$0xff]  ;;  %v1272_v38 = vld [vmem:[%s1466_s4 + $0x20] sm:$0xff]  ;;  %v1280_v41 = vld [vmem:[%s1466_s4 + $0x30] sm:$0xff] }
   0x6   :  { %959 = vmatmul.mubr.msk.f32.vlgmr.msra.gmra.mrb[0].mxu0 %vm90_vm1, %v1192_v4  ;;  %v1285_v43 = vld [vmem:[%s1466_s4 + $0x28] sm:$0xff]  ;;  %v1291_v45 = vld [vmem:[%s1466_s4 + $0x38] sm:$0xff]  ;;  %v1301_v56 = vld [vmem:[%s1467_s3] sm:$0xff] }
   0x7   :  { %178 = vmatprep.mubr.f32.mxu0 %v1130_v1  ;;  %85 = vperm.xlu1 %1111, %v39_v8   ;;  %v50_v6 = vld [vmem:[%s1468_s5 + $0x8] sm:$0xff]  ;;  %v49_v8 = vld [vmem:[%s1468_s5] sm:$0xff] }
   0x8   :  { %75 = vperm.xlu0 %1110, %v37_v7   ;;  %v52_v7 = vld [vmem:[%s1468_s5 + $0x18] sm:$0xff] }
   0xa   :  { %960 = vmatmul.mubr.msk.f32.gmra.mrb[2].mxu0 %vm90_vm1, %v1214_v9 }
   0xb   :  { %184 = vmatprep.mubr.f32.mxu0 %v1130_v1 }
   0xe   :  { %961 = vmatmul.mubr.msk.f32.gmra.mrb[4].mxu0 %vm90_vm1, %v1222_v10 }
   0xf   :  { %190 = vmatprep.mubr.f32.mxu0 %v1130_v1 }
  0x12   :  { %962 = vmatmul.mubr.msk.f32.gmra.mrb[6].mxu0 %vm90_vm1, %v1230_v11 }
  0x82   :  { %v1261_v25 = vpop.permute.xlu1 %80 }
  0x83   :  { %v1234_v12 = vpop.permute.xlu0 %70 }
  0x86   :  { %v1274_v39 = vpop.permute.xlu1 %85 }
  0x87   :  { %v1236_v15 = vpop.permute.xlu0 %75 }
  0xd9   :  { %v174_v13 = vpop.f32.mrb[0].mxu0 }
  0xda   :  { %v176_v14 = vpop.f32.mrb[1].mxu0  ;;  %v175_v16 = vadd.f32 %v174_v13, %v1234_v12  ;;  %v1315_v13 = vpack.c.bf16 %v52_v7, %v50_v6 }
  0xdb   :  { %v177_v18 = vadd.f32 %v176_v14, %v1234_v12  ;;  %v51_v14 = vld [vmem:[%s1468_s5 + $0x10] sm:$0xff] }
  0xdc   :  { %v197_v27 = vadd.f32 %v175_v16, %v1242_v17 }
  0xdd   :  { %v180_v20 = vpop.f32.mrb[2].mxu0  ;;  %v198_v32 = vadd.f32 %v177_v18, %v1254_v23 }
  0xde   :  { %v181_v21 = vadd.f32 %v180_v20, %v1236_v15  ;;  %v182_v22 = vpop.f32.mrb[3].mxu0  ;;  %v1326_v20 = vpack.c.bf16 %v51_v14, %v49_v8 }
  0xdf   :  { %v183_v26 = vadd.f32 %v182_v22, %v1236_v15  ;;  %v53_v22 = vld [vmem:[%s1468_s5 + $0x20] sm:$0xff] }
  0xe0   :  { %v199_v28 = vadd.f32 %v181_v21, %v1248_v19  ;;  %v1044_v29 = vpack.c.bf16 %v181_v21, %v175_v16  ;;  %v54_v16 = vld [vmem:[%s1468_s5 + $0x28] sm:$0xff] }
  0xe1   :  { %v1042_v30 = vpack.c.bf16 %v183_v26, %v177_v18  ;;  %v186_v31 = vpop.f32.mrb[4].mxu0  ;;  %v200_v33 = vadd.f32 %v183_v26, %v1259_v24  ;;  %v56_v18 = vld [vmem:[%s1468_s5 + $0x38] sm:$0xff]  ;;  %v55_v26 = vld [vmem:[%s1468_s5 + $0x30] sm:$0xff] }
  0xe2   :  { %v188_v34 = vpop.f32.mrb[5].mxu0  ;;  %v1036_v35 = vpack.c.bf16 %v199_v28, %v197_v27  ;;  %v187_v37 = vadd.f32 %v186_v31, %v1261_v25  ;;  %v1328_v21 = vpack.c.bf16 %v56_v18, %v54_v16  ;;  %v1338_v27 = vpack.c.bf16 %v55_v26, %v53_v22 }
  0xe3   :  { %1043 = vmatprep.subr.bf16.mxu0 %v1042_v30  ;;  %v1034_v36 = vpack.c.bf16 %v200_v33, %v198_v32  ;;  %v189_v40 = vadd.f32 %v188_v34, %v1261_v25  ;;  %v58_v34 = vld [vmem:[%s1469_s7] sm:$0xff] }
  0xe4   :  { %1045 = vmatpush1.bf16.xpose.msra.mxu0 %v1044_v29  ;;  %v201_v48 = vadd.f32 %v187_v37, %v1272_v38 }
  0xe5   :  { %v192_v42 = vpop.f32.mrb[6].mxu0  ;;  %1035 = vmatprep.subr.bf16.mxu1 %v1034_v36  ;;  %v202_v51 = vadd.f32 %v189_v40, %v1285_v43 }
  0xe6   :  { %v193_v44 = vadd.f32 %v192_v42, %v1274_v39  ;;  %v194_v46 = vpop.f32.mrb[7].mxu0  ;;  %1037 = vmatpush1.bf16.msra.mxu1 %v1036_v35  ;;  %v59_v35 = vld [vmem:[%s1469_s7 + $0x8] sm:$0xff]  ;;  %v61_v42 = vld [vmem:[%s1469_s7 + $0x18] sm:$0xff] }
  0xe7   :  { %v195_v47 = vadd.f32 %v194_v46, %v1274_v39  ;;  %v1350_v36 = vpack.c.bf16 %v59_v35, %v58_v34  ;;  %v62_v46 = vld [vmem:[%s1469_s7 + $0x20] sm:$0xff] }
  0xe8   :  { %v203_v49 = vadd.f32 %v193_v44, %v1280_v41  ;;  %v1048_v50 = vpack.c.bf16 %v193_v44, %v187_v37  ;;  %v1132_v37 = vmov 0.0|0.0  }
  0xe9   :  { %v204_v52 = vadd.f32 %v195_v47, %v1291_v45  ;;  %v1046_v53 = vpack.c.bf16 %v195_v47, %v189_v40  ;;  %v60_v40 = vld [vmem:[%s1469_s7 + $0x10] sm:$0xff]  ;;  %v63_v47 = vld [vmem:[%s1469_s7 + $0x28] sm:$0xff] }
  0xea   :  { %v1040_v54 = vpack.c.bf16 %v203_v49, %v201_v48  ;;  %v1361_v44 = vpack.c.bf16 %v61_v42, %v60_v40  ;;  %v967_v48 = vld [vmem:[%s1463_s0 + $0x8] sm:$0xff]  ;;  %v1374_v49 = vpack.c.bf16 %v63_v47, %v62_v46 }
  0xeb   :  { %1047 = vmatprep.subr.bf16.mxu0 %v1046_v53  ;;  %v1038_v55 = vpack.c.bf16 %v204_v52, %v202_v51  ;;  %v64_v51 = vld [vmem:[%s1469_s7 + $0x30] sm:$0xff]  ;;  %v65_v52 = vld [vmem:[%s1469_s7 + $0x38] sm:$0xff] }
  0xec   :  { %1049 = vmatpush1.bf16.xpose.msra.mxu0 %v1048_v50  ;;  %v540_v50 = vcombine.high %v967_v48, %v967_v48  ;;  %v1384_v53 = vpack.c.bf16 %v65_v52, %v64_v51 }
  0xed   :  { %1039 = vmatprep.subr.bf16.mxu1 %v1038_v55 }
  0xee   :  { %1041 = vmatpush1.bf16.msra.mxu1 %v1040_v54  ;;  %v366_v54 = vlaneseq }
  0xef   :  { %1051 = vmatprep.subr.bf16.mxu1 %v1315_v13 }
  0xf0   :  { %v367_v55 = vshrl.u32 %v366_v54, 7 }
  0xf1   :  { %963 = vmatmul.mubr.msk.f32.vlgmr.msra.gmra.mrb[0].mxu1 %vm205_vm2, %v1301_v56 }
  0xf2   :  { %443 = vmatprep.mubr.f32.mxu1 %v1130_v1  ;;  %1053 = vmatpush1.bf16.msra.mxu1 %v1326_v20  ;;  %v368_v6 = vsub.s32 0, %v367_v55 }
  0xf3   :  { %1055 = vmatprep.subr.bf16.mxu1 %v1328_v21 }
  0xf6   :  { %1057 = vmatpush1.bf16.msra.mxu1 %v1338_v27 }
  0xf7   :  { %1058 = vmatprep.subr.bf16.mxu1 %v1132_v37 }
 0x1c4   :  { %v275_v57 = vpop.f32.mrb[0].mxu1 }
 0x1c5   :  { %v277_v58 = vpop.f32.mrb[1].mxu1 }
 0x1c6   :  { %v280_v59 = vmax.f32 %v275_v57, %v277_v58 }
 0x1c8   :  { %281 = vmax.xlane.f32.xlu0 %v280_v59 }
 0x255   :  { %v282_v60 = vpop.xlane.xlu0 %281 }
 0x256   :  { %v283_v61 = vsub.f32 %v275_v57, %v282_v60  ;;  %v284_v62 = vsub.f32 %v277_v58, %v282_v60  ;;  %v372_v57 = vsub.s32 1, %v367_v55  ;;  %v57_v58 = vld [vmem:[%s1470_s6] sm:$0x3] }
 0x257   :  { %v1410_v7 = vrot.slane %v57_v58, %v368_v6 }
 0x258   :  { %v285_v63 = vmul.f32 1.442695, %v283_v61  ;;  %v287_v0 = vmul.f32 1.442695, %v284_v62  ;;  %v1393_v59 = vrot.slane %v57_v58, %v372_v57 }
 0x25a   :  { %1114 = vpow2.f32 %v285_v63 }
 0x25b   :  { %1116 = vpow2.f32 %v287_v0 }
 0x264   :  { %v1115_v2 = vpop.eup %1114 }
 0x265   :  { %v1117_v3 = vpop.eup %1116 }
 0x266   :  { %v289_v5 = vadd.f32 %v1117_v3, %v1115_v2 }
 0x268   :  { %290 = vadd.xlane.f32.xlu1 %v289_v5 }
 0x2f5   :  { %v291_v28 = vpop.xlane.xlu1 %290 }
 0x2f6   :  { %1118 = vrcp.f32 %v291_v28 }
 0x300   :  { %v1119_v29 = vpop.eup %1118 }
 0x301   :  { %v293_v30 = vmul.f32 %v1119_v29, %v1115_v2  ;;  %v294_v31 = vmul.f32 %v1119_v29, %v1117_v3 }
 0x303   :  { %359 = vmatprep.mubr.f32.mxu0 %v294_v31 }
 0x304   :  { %360 = vmatmul.mubr.f32.vlgmr.msra.gmra.mrb[8].mxu0 %v293_v30 }
 0x305   :  { %706 = vmatprep.mubr.f32.mxu0 %v1130_v1 }
 0x3d7   :  { %v361_v32 = vpop.f32.mrb[8].mxu0 }
 0x3d8   :  { %v363_v33 = vpop.f32.mrb[9].mxu0  ;;  %964 = vmatmul.mubr.msk.f32.vlgmr.msra.gmra.mrb[2].mxu1 %vm205_vm2, %v361_v32 }
 0x3d9   :  { %1060 = vmatpush3.bf16.msra.mxu1 %v1350_v36  ;;  %1012 = vmatprep.mubr.msk.f32.mxu1 %vm1133_vm3, %v1130_v1 }
 0x3da   :  { %1061 = vmatprep.subr.bf16.mxu1 %v1132_v37 }
 0x3dd   :  { %1063 = vmatpush3.bf16.msra.mxu1 %v1361_v44 }
 0x3de   :  { %1064 = vmatprep.subr.bf16.mxu1 %v1132_v37 }
 0x3e1   :  { %1066 = vmatpush3.bf16.msra.mxu1 %v1374_v49 }
 0x3e2   :  { %1067 = vmatprep.subr.bf16.mxu1 %v1132_v37 }
 0x3e5   :  { %1069 = vmatpush3.bf16.msra.mxu1 %v1384_v53 }
 0x3e6   :  { %968 = vmatprep.subr.msk.mxu1 %vm103_vm0, %v540_v50 }
 0x4ab   :  { %v445_v60 = vpop.f32.mrb[2].mxu1 }
 0x4ac   :  { %v447_v61 = vpop.f32.mrb[3].mxu1 }
 0x4ad   :  { %v448_v62 = vadd.f32 %v447_v61, %v1393_v59 }
 0x4af   :  { %v451_v63 = vmul.f32 0.70710677, %v448_v62  ;;  %v450_v2 = vmul.f32 0.5, %v448_v62 }
 0x4b1   :  { %1120 = verf.f32 %v451_v63 }
 0x4bb   :  { %v1121_v0 = vpop.eup %1120 }
 0x4bc   :  { %v453_v3 = vadd.f32 1.0, %v1121_v0 }
 0x4be   :  { %v454_v5 = vmul.f32 %v453_v3, %v450_v2 }
 0x4c0   :  { %1013 = vmatmul.mubr.msk.f32.vlgmr.msra.gmra.mrb[4].mxu1 %vm461_vm4, %v454_v5 }
 0x4c1   :  { %969 = vmatpush1.msk.msra.mxu1 %vm103_vm0, %v967_v48  ;;  %609 = vmatprep.mubr.f32.mxu1 %v1130_v1 }
 0x4c4   :  { %970 = vmatmul.mubr.msk.f32.vlgmr.msra.gmra.mrb[6].mxu1 %vm90_vm1, %v1192_v4  ;;  %v1415_v4 = vld [vmem:[%s1471_s8] ss:$0 sm:$0xff] }
 0x4c5   :  { %615 = vmatprep.mubr.f32.mxu1 %v1130_v1 }
 0x4c8   :  { %971 = vmatmul.mubr.msk.f32.gmra.mrb[8].mxu1 %vm90_vm1, %v1214_v9  ;;  %v446_v9 = vadd.f32 %v445_v60, %v1410_v7 }
 0x4c9   :  { %621 = vmatprep.mubr.f32.mxu1 %v1130_v1 }
 0x4cc   :  { %972 = vmatmul.mubr.msk.f32.gmra.mrb[10].mxu1 %vm90_vm1, %v1222_v10 }
 0x4cd   :  { %627 = vmatprep.mubr.f32.mxu1 %v1130_v1 }
 0x4d0   :  { %973 = vmatmul.mubr.msk.f32.gmra.mrb[12].mxu1 %vm90_vm1, %v1230_v11 }
 0x593   :  { %v531_v8 = vpop.f32.mrb[4].mxu1 }
 0x594   :  { %v532_v14 = vadd.f32 %v1415_v4, %v531_v8  ;;  %v1014_v16 = vpop.f32.mrb[5].mxu1 }
 0x596   :  { %v535_v10 = vadd.f32 %v532_v14, %v446_v9 }
 0x597   :  { %v611_v18 = vpop.f32.mrb[6].mxu1 }
 0x598   :  { %536 = vst [vmem:[%s1472_s9] sm:$0xff] %v535_v10  ;;  %v613_v11 = vpop.f32.mrb[7].mxu1  ;;  %v612_v22 = vadd.f32 %v611_v18, %v1234_v12 }
 0x599   :  { %v614_v26 = vadd.f32 %v613_v11, %v1234_v12 }
 0x59a   :  { %v634_v32 = vadd.f32 %v612_v22, %v1242_v17 }
 0x59b   :  { %v617_v28 = vpop.f32.mrb[8].mxu1  ;;  %v635_v35 = vadd.f32 %v614_v26, %v1254_v23 }
 0x59c   :  { %v618_v29 = vadd.f32 %v617_v28, %v1236_v15  ;;  %v619_v30 = vpop.f32.mrb[9].mxu1 }
 0x59d   :  { %v620_v31 = vadd.f32 %v619_v30, %v1236_v15 }
 0x59e   :  { %v636_v33 = vadd.f32 %v618_v29, %v1248_v19  ;;  %v1080_v34 = vpack.c.bf16 %v618_v29, %v612_v22 }
 0x59f   :  { %v637_v40 = vadd.f32 %v620_v31, %v1259_v24  ;;  %v1078_v42 = vpack.c.bf16 %v620_v31, %v614_v26  ;;  %v623_v46 = vpop.f32.mrb[10].mxu1 }
 0x5a0   :  { %v1072_v47 = vpack.c.bf16 %v636_v33, %v634_v32  ;;  %v625_v48 = vpop.f32.mrb[11].mxu1  ;;  %v624_v50 = vadd.f32 %v623_v46, %v1261_v25 }
 0x5a1   :  { %1079 = vmatprep.subr.bf16.mxu1 %v1078_v42  ;;  %v1070_v12 = vpack.c.bf16 %v637_v40, %v635_v35  ;;  %v626_v15 = vadd.f32 %v625_v48, %v1261_v25 }
 0x5a2   :  { %1081 = vmatpush1.bf16.xpose.msra.mxu1 %v1080_v34  ;;  %v638_v24 = vadd.f32 %v624_v50, %v1272_v38 }
 0x5a3   :  { %v629_v51 = vpop.f32.mrb[12].mxu1  ;;  %1071 = vmatprep.subr.bf16.mxu0 %v1070_v12  ;;  %v639_v55 = vadd.f32 %v626_v15, %v1285_v43 }
 0x5a4   :  { %v630_v17 = vadd.f32 %v629_v51, %v1274_v39  ;;  %v631_v19 = vpop.f32.mrb[13].mxu1  ;;  %1073 = vmatpush1.bf16.msra.mxu0 %v1072_v47 }
 0x5a5   :  { %v632_v23 = vadd.f32 %v631_v19, %v1274_v39 }
 0x5a6   :  { %v640_v52 = vadd.f32 %v630_v17, %v1280_v41  ;;  %v1084_v54 = vpack.c.bf16 %v630_v17, %v624_v50 }
 0x5a7   :  { %v641_v57 = vadd.f32 %v632_v23, %v1291_v45  ;;  %v1082_v58 = vpack.c.bf16 %v632_v23, %v626_v15 }
 0x5a8   :  { %v1076_v60 = vpack.c.bf16 %v640_v52, %v638_v24 }
 0x5a9   :  { %1083 = vmatprep.subr.bf16.mxu1 %v1082_v58  ;;  %v1074_v25 = vpack.c.bf16 %v641_v57, %v639_v55 }
 0x5aa   :  { %1085 = vmatpush1.bf16.xpose.msra.mxu1 %v1084_v54 }
 0x5ab   :  { %1075 = vmatprep.subr.bf16.mxu0 %v1074_v25 }
 0x5ac   :  { %1077 = vmatpush1.bf16.msra.mxu0 %v1076_v60 }
 0x5ad   :  { %1087 = vmatprep.subr.bf16.mxu0 %v1315_v13 }
 0x5af   :  { %974 = vmatmul.mubr.msk.f32.vlgmr.msra.gmra.mrb[10].mxu0 %vm205_vm2, %v1301_v56 }
 0x5b0   :  { %1089 = vmatpush1.bf16.msra.mxu0 %v1326_v20  ;;  %865 = vmatprep.mubr.f32.mxu0 %v1130_v1 }
 0x5b1   :  { %1091 = vmatprep.subr.bf16.mxu0 %v1328_v21 }
 0x5b4   :  { %1093 = vmatpush1.bf16.msra.mxu0 %v1338_v27 }
 0x5b5   :  { %1094 = vmatprep.subr.bf16.mxu0 %v1132_v37 }
 0x682   :  { %v708_v38 = vpop.f32.mrb[10].mxu0 }
 0x683   :  { %v710_v39 = vpop.f32.mrb[11].mxu0 }
 0x684   :  { %v713_v41 = vmax.f32 %v708_v38, %v710_v39 }
 0x686   :  { %714 = vmax.xlane.f32.xlu0 %v713_v41 }
 0x713   :  { %v715_v43 = vpop.xlane.xlu0 %714 }
 0x714   :  { %v716_v45 = vsub.f32 %v708_v38, %v715_v43  ;;  %v717_v13 = vsub.f32 %v710_v39, %v715_v43 }
 0x716   :  { %v718_v61 = vmul.f32 1.442695, %v716_v45  ;;  %v720_v62 = vmul.f32 1.442695, %v717_v13 }
 0x718   :  { %1122 = vpow2.f32 %v718_v61 }
 0x719   :  { %1124 = vpow2.f32 %v720_v62 }
 0x722   :  { %v1123_v56 = vpop.eup %1122 }
 0x723   :  { %v1125_v20 = vpop.eup %1124 }
 0x724   :  { %v722_v63 = vadd.f32 %v1125_v20, %v1123_v56 }
 0x726   :  { %723 = vadd.xlane.f32.xlu0 %v722_v63 }
 0x7b3   :  { %v724_v21 = vpop.xlane.xlu0 %723 }
 0x7b4   :  { %1126 = vrcp.f32 %v724_v21 }
 0x7be   :  { %v1127_v27 = vpop.eup %1126 }
 0x7bf   :  { %v726_v0 = vmul.f32 %v1127_v27, %v1123_v56  ;;  %v727_v2 = vmul.f32 %v1127_v27, %v1125_v20 }
 0x7c1   :  { %792 = vmatprep.mubr.f32.mxu1 %v727_v2 }
 0x7c2   :  { %793 = vmatmul.mubr.f32.vlgmr.msra.gmra.mrb[14].mxu1 %v726_v0 }
 0x895   :  { %v794_v3 = vpop.f32.mrb[14].mxu1 }
 0x896   :  { %v796_v5 = vpop.f32.mrb[15].mxu1  ;;  %975 = vmatmul.mubr.msk.f32.vlgmr.msra.gmra.mrb[12].mxu0 %vm205_vm2, %v794_v3 }
 0x897   :  { %1096 = vmatpush3.bf16.msra.mxu0 %v1350_v36  ;;  %1031 = vmatprep.mubr.msk.f32.mxu0 %vm1133_vm3, %v1130_v1 }
 0x898   :  { %1097 = vmatprep.subr.bf16.mxu0 %v1132_v37 }
 0x89b   :  { %1099 = vmatpush3.bf16.msra.mxu0 %v1361_v44 }
 0x89c   :  { %1100 = vmatprep.subr.bf16.mxu0 %v1132_v37 }
 0x89f   :  { %1102 = vmatpush3.bf16.msra.mxu0 %v1374_v49 }
 0x8a0   :  { %1103 = vmatprep.subr.bf16.mxu0 %v1132_v37 }
 0x8a3   :  { %1105 = vmatpush3.bf16.msra.mxu0 %v1384_v53 }
 0x969   :  { %v867_v6 = vpop.f32.mrb[12].mxu0 }
 0x96a   :  { %v869_v8 = vpop.f32.mrb[13].mxu0  ;;  %v868_v18 = vadd.f32 %v867_v6, %v1410_v7 }
 0x96b   :  { %v870_v9 = vadd.f32 %v869_v8, %v1393_v59 }
 0x96d   :  { %v873_v36 = vmul.f32 0.70710677, %v870_v9  ;;  %v872_v1 = vmul.f32 0.5, %v870_v9 }
 0x96f   :  { %1128 = verf.f32 %v873_v36 }
 0x979   :  { %v1129_v14 = vpop.eup %1128 }
 0x97a   :  { %v875_v16 = vadd.f32 1.0, %v1129_v14 }
 0x97c   :  { %v876_v10 = vmul.f32 %v875_v16, %v872_v1 }
 0x97e   :  { %1032 = vmatmul.mubr.msk.f32.vlgmr.msra.gmra.mrb[14].mxu0 %vm461_vm4, %v876_v10 }
 0xa51   :  { %v946_v44 = vpop.f32.mrb[14].mxu0 }
 0xa52   :  { %v947_v49 = vadd.f32 %v1415_v4, %v946_v44  ;;  %v1033_v37 = vpop.f32.mrb[15].mxu0 }
 0xa54   :  { %v950_v11 = vadd.f32 %v947_v49, %v868_v18 }
 0xa56   :  { %977 = vst [vmem:[%s1472_s9 + $0x8] sm:$0xff] %v950_v11 }

</bundles_post_ra>
